<compile_context>
chip_gen: v5e
topology: v5e:2x2
jax: 0.10.0
libtpu: 0.0.40
codegen_flags: <defaults>
</compile_context>

<pallas_src>
import functools

import jax
import jax.numpy as jnp
import numpy as np
from jax import lax
from jax.experimental import pallas as pl
from jax.experimental.pallas import tpu as pltpu

LANE = 128  # TPU lane width; channel / class dims are padded to this.


# ----------------------------------------------------------------------------
# Kernel 1: fused 3x3 conv + bias + ReLU + global average pool (backbone)
# ----------------------------------------------------------------------------
def conv_relu_gap_kernel(img_ref, w_ref, b_ref, out_ref, acc_ref, *, H, W, tile_h):
    """One grid step = (one batch element, tile_h output rows).

    img_ref: (1, Hp+2, W+2, Cin)  zero-padded NHWC image (block constant across rows)
    w_ref:   (9, Cin, Cpad)       per-tap conv weights (channel-padded, grid invariant)
    b_ref:   (1, Cpad)            conv bias (channel-padded)
    out_ref: (1, 1, Cpad)         pooled features (written once, at the last row tile)
    acc_ref: (1, Cpad) f32 VMEM   running spatial sum (GAP accumulator)
    """
    r = pl.program_id(1)
    cpad = acc_ref.shape[1]

    @pl.when(r == 0)
    def _init():
        acc_ref[...] = jnp.zeros_like(acc_ref)

    row0 = r * tile_h

    def row_body(y, acc):
        grow = row0 + y                              # global output row index
        row_acc = jnp.zeros((W, cpad), jnp.float32)
        # 9 taps accumulated as small matmuls -- no im2col materialization.
        for t in range(9):
            di, dj = t // 3, t % 3
            x = img_ref[0, pl.ds(grow + di, 1), pl.ds(dj, W), :]   # (1, W, Cin)
            row_acc = row_acc + jnp.dot(
                x[0], w_ref[t], preferred_element_type=jnp.float32)
        row_acc = jnp.maximum(row_acc + b_ref[...], 0.0)           # bias + ReLU
        row_sum = jnp.sum(row_acc, axis=0, keepdims=True)          # (1, Cpad)
        return acc + jnp.where(grow < H, row_sum, 0.0)             # mask padded rows

    acc_ref[...] += lax.fori_loop(
        0, tile_h, row_body, jnp.zeros((1, cpad), jnp.float32))

    @pl.when(r == pl.num_programs(1) - 1)
    def _finalize():
        # AdaptiveAvgPool2d((1,1)) == mean over the H*W valid pixels.
        out_ref[...] = (acc_ref[...] * (1.0 / float(H * W))).reshape(1, 1, cpad)


def conv_relu_gap(images, w, b, *, tile_h=8, c_pad=LANE):
    """NCHW images -> pooled features (B, c_pad); padded channels are exactly 0."""
    B, Cin, H, W = images.shape
    Cout = w.shape[0]
    assert c_pad >= Cout
    R = pl.cdiv(H, tile_h)
    Hp = R * tile_h

    # NCHW -> NHWC; 1-pixel conv halo + bottom zero-padding up to a row-tile multiple.
    x = jnp.transpose(images, (0, 2, 3, 1)).astype(jnp.float32)
    x = jnp.pad(x, ((0, 0), (1, 1 + Hp - H), (1, 1), (0, 0)))

    # (Cout, Cin, 3, 3) -> (tap=9, Cin, Cpad); channels padded to the lane width.
    w9 = jnp.transpose(w, (2, 3, 1, 0)).reshape(9, Cin, Cout).astype(jnp.float32)
    w9 = jnp.pad(w9, ((0, 0), (0, 0), (0, c_pad - Cout)))
    b2 = jnp.pad(b.reshape(1, Cout).astype(jnp.float32),
                 ((0, 0), (0, c_pad - Cout)))

    out = pl.pallas_call(
        functools.partial(conv_relu_gap_kernel, H=H, W=W, tile_h=tile_h),
        out_shape=jax.ShapeDtypeStruct((B, 1, c_pad), jnp.float32),
        grid=(B, R),
        in_specs=[
            pl.BlockSpec((1, Hp + 2, W + 2, Cin), lambda bb, r: (bb, 0, 0, 0)),
            pl.BlockSpec((9, Cin, c_pad), lambda bb, r: (0, 0, 0)),
            pl.BlockSpec((1, c_pad), lambda bb, r: (0, 0)),
        ],
        out_specs=pl.BlockSpec((1, 1, c_pad), lambda bb, r: (bb, 0, 0)),
        scratch_shapes=[pltpu.VMEM((1, c_pad), jnp.float32)],
        compiler_params=pltpu.CompilerParams(
            dimension_semantics=("parallel", "arbitrary"),
            vmem_limit_bytes=32 * 1024 * 1024,
        ),
    )(x, w9, b2)
    return out.reshape(B, c_pad)


# ----------------------------------------------------------------------------
# Kernel 2: linear head + (logits | softmax | cross-entropy loss)
# ----------------------------------------------------------------------------
def head_logits_kernel(f_ref, w_ref, b_ref, o_ref, *, num_classes, softmax):
    logits = jnp.dot(f_ref[...], w_ref[...],
                     preferred_element_type=jnp.float32) + b_ref[...]
    if softmax:
        lane = lax.broadcasted_iota(jnp.int32, logits.shape, 1)
        logits = jnp.where(lane < num_classes, logits, -1e30)  # mask padded classes
        m = jnp.max(logits, axis=-1, keepdims=True)
        e = jnp.exp(logits - m)
        o_ref[...] = e / jnp.sum(e, axis=-1, keepdims=True)
    else:
        o_ref[...] = logits


def head_loss_kernel(f_ref, w_ref, b_ref, onehot_ref, o_ref, *, num_classes):
    logits = jnp.dot(f_ref[...], w_ref[...],
                     preferred_element_type=jnp.float32) + b_ref[...]
    lane = lax.broadcasted_iota(jnp.int32, logits.shape, 1)
    masked = jnp.where(lane < num_classes, logits, -1e30)      # mask padded classes
    m = jnp.max(masked, axis=-1, keepdims=True)
    lse = m + jnp.log(jnp.sum(jnp.exp(masked - m), axis=-1, keepdims=True))
    tgt = jnp.sum(onehot_ref[...] * logits, axis=-1, keepdims=True)
    nll = lse - tgt                                            # (B, 1)
    o_ref[...] = jnp.mean(nll).reshape(1, 1)


def head_forward(feats, w_head, b_head, labels=None, mode="tensor", *, n_pad=LANE):
    B, Cpad = feats.shape
    num_classes, C = w_head.shape
    assert n_pad >= num_classes and Cpad >= C
    # torch Linear: y = x @ W.T + b ; pad both dims so the kernel is lane-dense.
    wT = jnp.pad(w_head.T.astype(jnp.float32),
                 ((0, Cpad - C), (0, n_pad - num_classes)))      # (Cpad, Npad)
    b2 = jnp.pad(b_head.reshape(1, num_classes).astype(jnp.float32),
                 ((0, 0), (0, n_pad - num_classes)))             # (1, Npad)

    base_specs = [
        pl.BlockSpec((B, Cpad), lambda i: (0, 0)),
        pl.BlockSpec((Cpad, n_pad), lambda i: (0, 0)),
        pl.BlockSpec((1, n_pad), lambda i: (0, 0)),
    ]

    if mode == "loss":
        # one-hot only built / DMA'd in loss mode; zeros on padded class lanes.
        onehot = jax.nn.one_hot(labels, n_pad, dtype=jnp.float32)
        loss = pl.pallas_call(
            functools.partial(head_loss_kernel, num_classes=num_classes),
            out_shape=jax.ShapeDtypeStruct((1, 1), jnp.float32),
            grid=(1,),
            in_specs=base_specs + [pl.BlockSpec((B, n_pad), lambda i: (0, 0))],
            out_specs=pl.BlockSpec((1, 1), lambda i: (0, 0)),
            compiler_params=pltpu.CompilerParams(dimension_semantics=("arbitrary",)),
        )(feats, wT, b2, onehot)
        return loss[0, 0]                                        # true scalar (mean CE)

    out = pl.pallas_call(
        functools.partial(head_logits_kernel, num_classes=num_classes,
                          softmax=(mode != "tensor")),
        out_shape=jax.ShapeDtypeStruct((B, n_pad), jnp.float32),
        grid=(1,),
        in_specs=base_specs,
        out_specs=pl.BlockSpec((B, n_pad), lambda i: (0, 0)),
        compiler_params=pltpu.CompilerParams(dimension_semantics=("arbitrary",)),
    )(feats, wT, b2)
    return out[:, :num_classes]


# ----------------------------------------------------------------------------
# Module-level forward (matches TVModelWithLossComputation.forward semantics)
# ----------------------------------------------------------------------------
def tv_model_forward(params, images, labels=None, mode="tensor"):
    feats = conv_relu_gap(images, params["conv_w"], params["conv_b"])   # (B, 128) pooled
    return head_forward(feats, params["head_w"], params["head_b"],
                        labels=labels, mode=mode)


# ----------------------------------------------------------------------------
# Pure-JAX reference of the same forward pass (for correctness checking)
# ----------------------------------------------------------------------------
def ref_forward(params, images, labels=None, mode="tensor"):
    x = lax.conv_general_dilated(
        images, params["conv_w"], window_strides=(1, 1),
        padding=((1, 1), (1, 1)),
        dimension_numbers=("NCHW", "OIHW", "NCHW"))
    x = jnp.maximum(x + params["conv_b"][None, :, None, None], 0.0)
    f = jnp.mean(x, axis=(2, 3))                                 # GAP + flatten
    logits = f @ params["head_w"].T + params["head_b"]
    if mode == "tensor":
        return logits
    if mode == "loss":
        lse = jax.scipy.special.logsumexp(logits, axis=-1)
        tgt = jnp.take_along_axis(logits, labels[:, None], axis=-1)[:, 0]
        return jnp.mean(lse - tgt)
    return jax.nn.softmax(logits, axis=-1)


if __name__ == "__main__":
    B, Cin, H, W = 2, 3, 16, 16
    feat_channels, num_classes = 32, 10

    key = jax.random.PRNGKey(0)
    k1, k2, k3, k4, k5 = jax.random.split(key, 5)
    images = jax.random.normal(k1, (B, Cin, H, W), jnp.float32)
    labels = jax.random.randint(k2, (B,), 0, num_classes)

    params = {
        "conv_w": 0.1 * jax.random.normal(k3, (feat_channels, Cin, 3, 3), jnp.float32),
        "conv_b": 0.01 * jax.random.normal(k5, (feat_channels,), jnp.float32),
        "head_w": 0.1 * jax.random.normal(k4, (num_classes, feat_channels), jnp.float32),
        "head_b": 0.01 * jax.random.normal(k5, (num_classes,), jnp.float32),
    }

    logits = tv_model_forward(params, images, mode="tensor")       # (B, num_classes)
    probs = tv_model_forward(params, images, mode="predict")       # softmax(dim=-1)
    loss = tv_model_forward(params, images, labels, mode="loss")   # scalar CE loss
    jax.block_until_ready((logits, probs, loss))

    assert logits.shape == (B, num_classes)
    assert probs.shape == (B, num_classes)
    assert loss.shape == ()

    np.testing.assert_allclose(logits, ref_forward(params, images, mode="tensor"),
                               rtol=2e-3, atol=2e-3)
    np.testing.assert_allclose(probs, ref_forward(params, images, mode="predict"),
                               rtol=2e-3, atol=2e-3)
    np.testing.assert_allclose(loss, ref_forward(params, images, labels, mode="loss"),
                               rtol=2e-3, atol=2e-3)
    print("KERNEL_OK")
</pallas_src>

<mosaic_0001>
module attributes {stable_mosaic.version = 11 : i64} {
  func.func @conv_relu_gap_kernel(%arg0: i32, %arg1: i32, %arg2: memref<1x18x18x3xf32, #tpu.memory_space<vmem>>, %arg3: memref<9x3x128xf32, #tpu.memory_space<vmem>>, %arg4: memref<1x128xf32, #tpu.memory_space<vmem>>, %arg5: memref<1x1x128xf32, #tpu.memory_space<vmem>>, %arg6: memref<1x128xf32, #tpu.memory_space<vmem>>) attributes {dimension_semantics = [#tpu.dimension_semantics<parallel>, #tpu.dimension_semantics<arbitrary>], iteration_bounds = array<i64: 2, 2>, scalar_prefetch = 0 : i64, scratch_operands = 1 : i64, tpu.core_type = #tpu.core_type<tc>, window_params = [{transform_indices = @transform_0, window_bounds = array<i64: 1, 18, 18, 3>}, {pipeline_mode = #tpu.pipeline_mode<synchronous>, transform_indices = @transform_1, window_bounds = array<i64: 9, 3, 128>}, {pipeline_mode = #tpu.pipeline_mode<synchronous>, transform_indices = @transform_2, window_bounds = array<i64: 1, 128>}, {transform_indices = @transform_3, window_bounds = array<i64: 1, 1, 128>}]} {
    %c0_i32 = arith.constant 0 : i32
    %0 = arith.cmpi eq, %arg1, %c0_i32 : i32
    %1 = arith.extui %0 : i1 to i32
    %c0_i32_0 = arith.constant 0 : i32
    %2 = arith.cmpi ne, %1, %c0_i32_0 : i32
    scf.if %2 {
      %cst_9 = arith.constant 0.000000e+00 : f32
      %13 = vector.broadcast %cst_9 : f32 to vector<1x128xf32>
      %c0_10 = arith.constant 0 : index
      %c0_11 = arith.constant 0 : index
      %14 = vector.load %arg6[%c0_10, %c0_11] : memref<1x128xf32, #tpu.memory_space<vmem>>, vector<1x128xf32>
      tpu.vector_store %arg6[%c0_10, %c0_11], %13 {strides = array<i32>} : memref<1x128xf32, #tpu.memory_space<vmem>>, vector<1x128xf32>,
    } else {
    }
    %c8_i32 = arith.constant 8 : i32
    %3 = arith.muli %arg1, %c8_i32 : i32
    %c0 = arith.constant 0 : index
    %c0_1 = arith.constant 0 : index
    %4 = vector.load %arg6[%c0, %c0_1] : memref<1x128xf32, #tpu.memory_space<vmem>>, vector<1x128xf32>
    %cst = arith.constant 0.000000e+00 : f32
    %5 = vector.broadcast %cst : f32 to vector<1x128xf32>
    %c0_i32_2 = arith.constant 0 : i32
    %c8_i32_3 = arith.constant 8 : i32
    %6 = arith.addi %c0_i32_2, %c8_i32_3 : i32
    %c1_i32 = arith.constant 1 : i32
    %7 = scf.for %arg7 = %c0_i32_2 to %6 step %c1_i32 iter_args(%arg8 = %5) -> (vector<1x128xf32>)  : i32 {
      %13 = arith.addi %3, %arg7 : i32
      %cst_9 = arith.constant 0.000000e+00 : f32
      %14 = vector.broadcast %cst_9 : f32 to vector<16x128xf32>
      %c0_i32_10 = arith.constant 0 : i32
      %15 = arith.addi %13, %c0_i32_10 : i32
      %c0_11 = arith.constant 0 : index
      %16 = arith.index_cast %15 : i32 to index
      %c0_12 = arith.constant 0 : index
      %c0_13 = arith.constant 0 : index
      %17 = vector.load %arg2[%c0_11, %16, %c0_12, %c0_13] : memref<1x18x18x3xf32, #tpu.memory_space<vmem>>, vector<1x1x16x3xf32>
      %18 = vector.shape_cast %17 : vector<1x1x16x3xf32> to vector<1x16x3xf32>
      %19 = vector.shape_cast %18 : vector<1x16x3xf32> to vector<16x3xf32>
      %c0_14 = arith.constant 0 : index
      %c0_15 = arith.constant 0 : index
      %c0_16 = arith.constant 0 : index
      %20 = vector.load %arg3[%c0_14, %c0_15, %c0_16] : memref<9x3x128xf32, #tpu.memory_space<vmem>>, vector<1x3x128xf32>
      %21 = vector.shape_cast %20 : vector<1x3x128xf32> to vector<3x128xf32>
      %cst_17 = arith.constant dense<0.000000e+00> : vector<16x128xf32>
      %22 = tpu.matmul %19, %21, %cst_17 {dimension_numbers = #tpu.dot_dimension_numbers<[1], [0], [0], [1], [0, 0, 1, 1], [], []>} : vector<16x3xf32>, vector<3x128xf32>, vector<16x128xf32> -> vector<16x128xf32>
      %23 = arith.addf %14, %22 : vector<16x128xf32>
      %c0_i32_18 = arith.constant 0 : i32
      %24 = arith.addi %13, %c0_i32_18 : i32
      %c0_19 = arith.constant 0 : index
      %25 = arith.index_cast %24 : i32 to index
      %c1 = arith.constant 1 : index
      %c0_20 = arith.constant 0 : index
      %26 = vector.load %arg2[%c0_19, %25, %c1, %c0_20] : memref<1x18x18x3xf32, #tpu.memory_space<vmem>>, vector<1x1x16x3xf32>
      %27 = vector.shape_cast %26 : vector<1x1x16x3xf32> to vector<1x16x3xf32>
      %28 = vector.shape_cast %27 : vector<1x16x3xf32> to vector<16x3xf32>
      %c1_21 = arith.constant 1 : index
      %c0_22 = arith.constant 0 : index
      %c0_23 = arith.constant 0 : index
      %29 = vector.load %arg3[%c1_21, %c0_22, %c0_23] : memref<9x3x128xf32, #tpu.memory_space<vmem>>, vector<1x3x128xf32>
      %30 = vector.shape_cast %29 : vector<1x3x128xf32> to vector<3x128xf32>
      %cst_24 = arith.constant dense<0.000000e+00> : vector<16x128xf32>
      %31 = tpu.matmul %28, %30, %cst_24 {dimension_numbers = #tpu.dot_dimension_numbers<[1], [0], [0], [1], [0, 0, 1, 1], [], []>} : vector<16x3xf32>, vector<3x128xf32>, vector<16x128xf32> -> vector<16x128xf32>
      %32 = arith.addf %23, %31 : vector<16x128xf32>
      %c0_i32_25 = arith.constant 0 : i32
      %33 = arith.addi %13, %c0_i32_25 : i32
      %c0_26 = arith.constant 0 : index
      %34 = arith.index_cast %33 : i32 to index
      %c2 = arith.constant 2 : index
      %c0_27 = arith.constant 0 : index
      %35 = vector.load %arg2[%c0_26, %34, %c2, %c0_27] : memref<1x18x18x3xf32, #tpu.memory_space<vmem>>, vector<1x1x16x3xf32>
      %36 = vector.shape_cast %35 : vector<1x1x16x3xf32> to vector<1x16x3xf32>
      %37 = vector.shape_cast %36 : vector<1x16x3xf32> to vector<16x3xf32>
      %c2_28 = arith.constant 2 : index
      %c0_29 = arith.constant 0 : index
      %c0_30 = arith.constant 0 : index
      %38 = vector.load %arg3[%c2_28, %c0_29, %c0_30] : memref<9x3x128xf32, #tpu.memory_space<vmem>>, vector<1x3x128xf32>
      %39 = vector.shape_cast %38 : vector<1x3x128xf32> to vector<3x128xf32>
      %cst_31 = arith.constant dense<0.000000e+00> : vector<16x128xf32>
      %40 = tpu.matmul %37, %39, %cst_31 {dimension_numbers = #tpu.dot_dimension_numbers<[1], [0], [0], [1], [0, 0, 1, 1], [], []>} : vector<16x3xf32>, vector<3x128xf32>, vector<16x128xf32> -> vector<16x128xf32>
      %41 = arith.addf %32, %40 : vector<16x128xf32>
      %c1_i32_32 = arith.constant 1 : i32
      %42 = arith.addi %13, %c1_i32_32 : i32
      %c0_33 = arith.constant 0 : index
      %43 = arith.index_cast %42 : i32 to index
      %c0_34 = arith.constant 0 : index
      %c0_35 = arith.constant 0 : index
      %44 = vector.load %arg2[%c0_33, %43, %c0_34, %c0_35] : memref<1x18x18x3xf32, #tpu.memory_space<vmem>>, vector<1x1x16x3xf32>
      %45 = vector.shape_cast %44 : vector<1x1x16x3xf32> to vector<1x16x3xf32>
      %46 = vector.shape_cast %45 : vector<1x16x3xf32> to vector<16x3xf32>
      %c3 = arith.constant 3 : index
      %c0_36 = arith.constant 0 : index
      %c0_37 = arith.constant 0 : index
      %47 = vector.load %arg3[%c3, %c0_36, %c0_37] : memref<9x3x128xf32, #tpu.memory_space<vmem>>, vector<1x3x128xf32>
      %48 = vector.shape_cast %47 : vector<1x3x128xf32> to vector<3x128xf32>
      %cst_38 = arith.constant dense<0.000000e+00> : vector<16x128xf32>
      %49 = tpu.matmul %46, %48, %cst_38 {dimension_numbers = #tpu.dot_dimension_numbers<[1], [0], [0], [1], [0, 0, 1, 1], [], []>} : vector<16x3xf32>, vector<3x128xf32>, vector<16x128xf32> -> vector<16x128xf32>
      %50 = arith.addf %41, %49 : vector<16x128xf32>
      %c1_i32_39 = arith.constant 1 : i32
      %51 = arith.addi %13, %c1_i32_39 : i32
      %c0_40 = arith.constant 0 : index
      %52 = arith.index_cast %51 : i32 to index
      %c1_41 = arith.constant 1 : index
      %c0_42 = arith.constant 0 : index
      %53 = vector.load %arg2[%c0_40, %52, %c1_41, %c0_42] : memref<1x18x18x3xf32, #tpu.memory_space<vmem>>, vector<1x1x16x3xf32>
      %54 = vector.shape_cast %53 : vector<1x1x16x3xf32> to vector<1x16x3xf32>
      %55 = vector.shape_cast %54 : vector<1x16x3xf32> to vector<16x3xf32>
      %c4 = arith.constant 4 : index
      %c0_43 = arith.constant 0 : index
      %c0_44 = arith.constant 0 : index
      %56 = vector.load %arg3[%c4, %c0_43, %c0_44] : memref<9x3x128xf32, #tpu.memory_space<vmem>>, vector<1x3x128xf32>
      %57 = vector.shape_cast %56 : vector<1x3x128xf32> to vector<3x128xf32>
      %cst_45 = arith.constant dense<0.000000e+00> : vector<16x128xf32>
      %58 = tpu.matmul %55, %57, %cst_45 {dimension_numbers = #tpu.dot_dimension_numbers<[1], [0], [0], [1], [0, 0, 1, 1], [], []>} : vector<16x3xf32>, vector<3x128xf32>, vector<16x128xf32> -> vector<16x128xf32>
      %59 = arith.addf %50, %58 : vector<16x128xf32>
      %c1_i32_46 = arith.constant 1 : i32
      %60 = arith.addi %13, %c1_i32_46 : i32
      %c0_47 = arith.constant 0 : index
      %61 = arith.index_cast %60 : i32 to index
      %c2_48 = arith.constant 2 : index
      %c0_49 = arith.constant 0 : index
      %62 = vector.load %arg2[%c0_47, %61, %c2_48, %c0_49] : memref<1x18x18x3xf32, #tpu.memory_space<vmem>>, vector<1x1x16x3xf32>
      %63 = vector.shape_cast %62 : vector<1x1x16x3xf32> to vector<1x16x3xf32>
      %64 = vector.shape_cast %63 : vector<1x16x3xf32> to vector<16x3xf32>
      %c5 = arith.constant 5 : index
      %c0_50 = arith.constant 0 : index
      %c0_51 = arith.constant 0 : index
      %65 = vector.load %arg3[%c5, %c0_50, %c0_51] : memref<9x3x128xf32, #tpu.memory_space<vmem>>, vector<1x3x128xf32>
      %66 = vector.shape_cast %65 : vector<1x3x128xf32> to vector<3x128xf32>
      %cst_52 = arith.constant dense<0.000000e+00> : vector<16x128xf32>
      %67 = tpu.matmul %64, %66, %cst_52 {dimension_numbers = #tpu.dot_dimension_numbers<[1], [0], [0], [1], [0, 0, 1, 1], [], []>} : vector<16x3xf32>, vector<3x128xf32>, vector<16x128xf32> -> vector<16x128xf32>
      %68 = arith.addf %59, %67 : vector<16x128xf32>
      %c2_i32 = arith.constant 2 : i32
      %69 = arith.addi %13, %c2_i32 : i32
      %c0_53 = arith.constant 0 : index
      %70 = arith.index_cast %69 : i32 to index
      %c0_54 = arith.constant 0 : index
      %c0_55 = arith.constant 0 : index
      %71 = vector.load %arg2[%c0_53, %70, %c0_54, %c0_55] : memref<1x18x18x3xf32, #tpu.memory_space<vmem>>, vector<1x1x16x3xf32>
      %72 = vector.shape_cast %71 : vector<1x1x16x3xf32> to vector<1x16x3xf32>
      %73 = vector.shape_cast %72 : vector<1x16x3xf32> to vector<16x3xf32>
      %c6 = arith.constant 6 : index
      %c0_56 = arith.constant 0 : index
      %c0_57 = arith.constant 0 : index
      %74 = vector.load %arg3[%c6, %c0_56, %c0_57] : memref<9x3x128xf32, #tpu.memory_space<vmem>>, vector<1x3x128xf32>
      %75 = vector.shape_cast %74 : vector<1x3x128xf32> to vector<3x128xf32>
      %cst_58 = arith.constant dense<0.000000e+00> : vector<16x128xf32>
      %76 = tpu.matmul %73, %75, %cst_58 {dimension_numbers = #tpu.dot_dimension_numbers<[1], [0], [0], [1], [0, 0, 1, 1], [], []>} : vector<16x3xf32>, vector<3x128xf32>, vector<16x128xf32> -> vector<16x128xf32>
      %77 = arith.addf %68, %76 : vector<16x128xf32>
      %c2_i32_59 = arith.constant 2 : i32
      %78 = arith.addi %13, %c2_i32_59 : i32
      %c0_60 = arith.constant 0 : index
      %79 = arith.index_cast %78 : i32 to index
      %c1_61 = arith.constant 1 : index
      %c0_62 = arith.constant 0 : index
      %80 = vector.load %arg2[%c0_60, %79, %c1_61, %c0_62] : memref<1x18x18x3xf32, #tpu.memory_space<vmem>>, vector<1x1x16x3xf32>
      %81 = vector.shape_cast %80 : vector<1x1x16x3xf32> to vector<1x16x3xf32>
      %82 = vector.shape_cast %81 : vector<1x16x3xf32> to vector<16x3xf32>
      %c7 = arith.constant 7 : index
      %c0_63 = arith.constant 0 : index
      %c0_64 = arith.constant 0 : index
      %83 = vector.load %arg3[%c7, %c0_63, %c0_64] : memref<9x3x128xf32, #tpu.memory_space<vmem>>, vector<1x3x128xf32>
      %84 = vector.shape_cast %83 : vector<1x3x128xf32> to vector<3x128xf32>
      %cst_65 = arith.constant dense<0.000000e+00> : vector<16x128xf32>
      %85 = tpu.matmul %82, %84, %cst_65 {dimension_numbers = #tpu.dot_dimension_numbers<[1], [0], [0], [1], [0, 0, 1, 1], [], []>} : vector<16x3xf32>, vector<3x128xf32>, vector<16x128xf32> -> vector<16x128xf32>
      %86 = arith.addf %77, %85 : vector<16x128xf32>
      %c2_i32_66 = arith.constant 2 : i32
      %87 = arith.addi %13, %c2_i32_66 : i32
      %c0_67 = arith.constant 0 : index
      %88 = arith.index_cast %87 : i32 to index
      %c2_68 = arith.constant 2 : index
      %c0_69 = arith.constant 0 : index
      %89 = vector.load %arg2[%c0_67, %88, %c2_68, %c0_69] : memref<1x18x18x3xf32, #tpu.memory_space<vmem>>, vector<1x1x16x3xf32>
      %90 = vector.shape_cast %89 : vector<1x1x16x3xf32> to vector<1x16x3xf32>
      %91 = vector.shape_cast %90 : vector<1x16x3xf32> to vector<16x3xf32>
      %c8 = arith.constant 8 : index
      %c0_70 = arith.constant 0 : index
      %c0_71 = arith.constant 0 : index
      %92 = vector.load %arg3[%c8, %c0_70, %c0_71] : memref<9x3x128xf32, #tpu.memory_space<vmem>>, vector<1x3x128xf32>
      %93 = vector.shape_cast %92 : vector<1x3x128xf32> to vector<3x128xf32>
      %cst_72 = arith.constant dense<0.000000e+00> : vector<16x128xf32>
      %94 = tpu.matmul %91, %93, %cst_72 {dimension_numbers = #tpu.dot_dimension_numbers<[1], [0], [0], [1], [0, 0, 1, 1], [], []>} : vector<16x3xf32>, vector<3x128xf32>, vector<16x128xf32> -> vector<16x128xf32>
      %95 = arith.addf %86, %94 : vector<16x128xf32>
      %c0_73 = arith.constant 0 : index
      %c0_74 = arith.constant 0 : index
      %96 = vector.load %arg4[%c0_73, %c0_74] : memref<1x128xf32, #tpu.memory_space<vmem>>, vector<1x128xf32>
      %97 = vector.broadcast %96 : vector<1x128xf32> to vector<16x128xf32>
      %98 = arith.addf %95, %97 : vector<16x128xf32>
      %cst_75 = arith.constant 0.000000e+00 : f32
      %99 = vector.broadcast %cst_75 : f32 to vector<16x128xf32>
      %100 = arith.maximumf %98, %99 : vector<16x128xf32>
      %cst_76 = arith.constant dense<0.000000e+00> : vector<128xf32>
      %101 = vector.multi_reduction <add>, %100, %cst_76 [0] : vector<16x128xf32> to vector<128xf32>
      %102 = vector.shape_cast %101 : vector<128xf32> to vector<1x128xf32>
      %c16_i32 = arith.constant 16 : i32
      %103 = arith.cmpi slt, %13, %c16_i32 : i32
      %cst_77 = arith.constant 0.000000e+00 : f32
      %104 = vector.broadcast %cst_77 : f32 to vector<1x128xf32>
      %105 = arith.select %103, %102, %104 : vector<1x128xf32>
      %106 = arith.addf %arg8, %105 : vector<1x128xf32>
      scf.yield %106 : vector<1x128xf32>
    }
    %c8_i32_4 = arith.constant 8 : i32
    %8 = arith.addf %4, %7 : vector<1x128xf32>
    %c0_5 = arith.constant 0 : index
    %c0_6 = arith.constant 0 : index
    %9 = vector.load %arg6[%c0_5, %c0_6] : memref<1x128xf32, #tpu.memory_space<vmem>>, vector<1x128xf32>
    tpu.vector_store %arg6[%c0_5, %c0_6], %8 {strides = array<i32>} : memref<1x128xf32, #tpu.memory_space<vmem>>, vector<1x128xf32>,
    %c1_i32_7 = arith.constant 1 : i32
    %10 = arith.cmpi eq, %arg1, %c1_i32_7 : i32
    %11 = arith.extui %10 : i1 to i32
    %c0_i32_8 = arith.constant 0 : i32
    %12 = arith.cmpi ne, %11, %c0_i32_8 : i32
    scf.if %12 {
      %c0_9 = arith.constant 0 : index
      %c0_10 = arith.constant 0 : index
      %13 = vector.load %arg6[%c0_9, %c0_10] : memref<1x128xf32, #tpu.memory_space<vmem>>, vector<1x128xf32>
      %cst_11 = arith.constant 3.906250e-03 : f32
      %14 = vector.broadcast %cst_11 : f32 to vector<1x128xf32>
      %15 = arith.mulf %13, %14 : vector<1x128xf32>
      %16 = vector.shape_cast %15 : vector<1x128xf32> to vector<1x1x128xf32>
      %c0_12 = arith.constant 0 : index
      %c0_13 = arith.constant 0 : index
      %c0_14 = arith.constant 0 : index
      %17 = vector.load %arg5[%c0_12, %c0_13, %c0_14] : memref<1x1x128xf32, #tpu.memory_space<vmem>>, vector<1x1x128xf32>
      tpu.vector_store %arg5[%c0_12, %c0_13, %c0_14], %16 {strides = array<i32>} : memref<1x1x128xf32, #tpu.memory_space<vmem>>, vector<1x1x128xf32>,
    } else {
    }
    return
  }
  func.func @transform_0(%arg0: i32, %arg1: i32) -> (i32, i32, i32, i32) {
    %c0_i32 = arith.constant 0 : i32
    %c0_i32_0 = arith.constant 0 : i32
    %c0_i32_1 = arith.constant 0 : i32
    %c0_i32_2 = arith.constant 0 : i32
    return %arg0, %c0_i32, %c0_i32_0, %c0_i32_1 : i32, i32, i32, i32
  }
  func.func @transform_1(%arg0: i32, %arg1: i32) -> (i32, i32, i32) {
    %c0_i32 = arith.constant 0 : i32
    %c0_i32_0 = arith.constant 0 : i32
    %c0_i32_1 = arith.constant 0 : i32
    %c0_i32_2 = arith.constant 0 : i32
    return %c0_i32, %c0_i32_0, %c0_i32_1 : i32, i32, i32
  }
  func.func @transform_2(%arg0: i32, %arg1: i32) -> (i32, i32) {
    %c0_i32 = arith.constant 0 : i32
    %c0_i32_0 = arith.constant 0 : i32
    %c0_i32_1 = arith.constant 0 : i32
    return %c0_i32, %c0_i32_0 : i32, i32
  }
  func.func @transform_3(%arg0: i32, %arg1: i32) -> (i32, i32, i32) {
    %c0_i32 = arith.constant 0 : i32
    %c0_i32_0 = arith.constant 0 : i32
    %c0_i32_1 = arith.constant 0 : i32
    return %arg0, %c0_i32, %c0_i32_0 : i32, i32, i32
  }
}

</mosaic_0001>

<bundles_post_ra>
// kernel: tpu_custom_call.1
= control target key start
LH: loop header
LB: loop body
LE: loop exit
PB: predicated region body
PF: predicated region fallthrough
CT: control target
= control target key end

     0   :  { %8 = vsyncpa [#allocation4], 0  ;;  %s1192_s0 = inlined_call_operand.vmem [shape: f32[2,18,18,3], index: 0, kind: input, shape index: {}]   ;;  %s1193_s1 = inlined_call_operand.vmem [shape: f32[9,3,128], index: 1, kind: input, shape index: {}]   ;;  %s1194_s2 = inlined_call_operand.vmem [shape: f32[1,128], index: 2, kind: input, shape index: {}]   ;;  %s1195_s3 = inlined_call_operand.hbm [shape: f32[2,1,128], index: 3, kind: output, shape index: {}]  }
   0x1   :  { %10 = vsyncpa [#allocation4 + $0x1], 0  ;;  %s957_s12 = smov 0   ;;  %s959_s13 = smov 0  }
   0x2   :  { %s961_s14 = smov 0   ;;  %s963_s15 = smov 0  }
   0x3   :  { %s965_s16 = smov 0   ;;  %s967_s17 = smov 0  }
   0x4   :  { %s969_s18 = smov 0   ;;  %s971_s19 = smov 0  }
   0x5 LB: > { %s673_s20 = sadd.s32 4294967295, %s926_s19   ;;  %s674_s21 = sadd.s32 4294967294, %s926_s19   ;;  %s926_s19 = sphi %s971_s19, %s16_s19   ;;  %s922_s18 = sphi %s969_s18, %s1205_s18   ;;  %s918_s17 = sphi %s967_s17, %s1204_s17   ;;  %s914_s16 = sphi %s965_s16, %s1203_s16   ;;  %s910_s15 = sphi %s963_s15, %s1202_s15   ;;  %s906_s14 = sphi %s961_s14, %s1201_s14   ;;  %s902_s13 = sphi %s959_s13, %s1200_s13   ;;  %s898_s12 = sphi %s957_s12, %s1199_s12  }
   0x6   : > { %s25_s22 = sadd.s32 1, %s918_s17  ;;  %s28_s23 = sadd.s32 1, %s922_s18 }
   0x7   : > { %p26_p0 = scmp.ge.s32.totalorder %s25_s22, 2  ;;  %p113_p1 = scmp.ne.s32.totalorder %s906_s14, %s902_s13 }
   0x8   : > { %p114_p2 = scmp.eq.s32.totalorder %s673_s20, 3  ;;  %p119_p4 = scmp.ne.s32.totalorder %s902_s13, %s898_s12 }
   0x9   : > { %s1207_s22 = smov (%p26_p0, %s25_s22), 0  ;;  %s1209_s23 = smov (!%p26_p0, %s28_s23), %s922_s18 }
   0xa   : > { %p1006_p3 = por %p114_p2, %p113_p1  ;;  %p30_p5 = scmp.ge.s32.totalorder %s1209_s23, 2 }
   0xb   : > { %p120_p6 = scmp.eq.s32.totalorder %s674_s21, 3  ;;  %p677_p7 = scmp.ge.s32.totalorder %s926_s19, 1 }
   0xc   : > { %p152_p8 = scmp.lt.s32.totalorder %s926_s19, 5  ;;  %s1211_s23 = smov (%p30_p5, %s1209_s23), 0 }
   0xd   : > { %p1016_p9 = por %p120_p6, %p119_p4  ;;  %s100_s26 = ssub.s32 %s922_s18, %s1211_s23 }
   0xe   : > { %p153_p10 = pnand %p677_p7, %p152_p8  ;;  %s103_s27 = sadd.s32 1, %s906_s14 }
   0xf   : > { %p101_p11 = scmp.eq.s32.totalorder %s100_s26, 0  ;;  %s173_s29 = sand.u32 (!%p153_p10), 1, %s902_s13  }
  0x10   : > { %156 = sbr.rel (%p153_p10) target bundleno = 256 (0x100), region = 32  ;;  %p175_p12 = scmp.lt.s32.totalorder (!%p153_p10), %s914_s16, 1 }
  0x11   : > { %s1024_s28 = scalar_select %p101_p11, %s906_s14, %s103_s27  }
  0x12   : > { %s1036_s8 = scalar_lea.vmem (!%p153_p10), [#allocation3], %s173_s29  ;;  %p679_p13 = scmp.ne.s32.totalorder (!%p153_p10), %s910_s15, 0 }
  0x15   : > { %s176_s30 = scalar_select %p175_p12, %s914_s16, 1 }
  0x16   : > { %183 = sbr.rel (%p679_p13) target bundleno = 29 (0x1d), region = 36 }
  0x17   : > { %s734_s4 = smul.u32 432, %s176_s30 }
  0x19   : > { %s1032_s7 = scalar_lea.vmem %s1192_s0, %s734_s4 }
  0x1b   : > { %v936_v0 = vmov 0.0  }
  0x1c   : > { %184 = vst [vmem:[#allocation2] sm:$0x1] %v936_v0 }
  0x1d PF: > { %s680_s9 = sshll.u32 %s910_s15, 3  ;;  %v1042_v2 = vmov 0.0   ;;  %s1044_s10 = smov 0  }
  0x23   : > { %v1040_v1 = vld [vmem:[#allocation2] sm:$0x1] }
  0x24 LB: >> { %v681_v3 = vld [vmem:[%s1193_s1 + $0x4] sm:$0x7]  ;;  %vm211_vm0 = vcmask 1042432   ;;  %v199_v4 = vld [vmem:[%s1193_s1] sm:$0x7]  ;;  %s1072_s20 = sadd.s32 %s934_s10, %s680_s9  ;;  %vm204_vm1 = vcmask 23552   ;;  %s934_s10 = sphi %s1044_s10, %s192_s10   ;;  %v930_v2 = vphi %v1042_v2, %v1198_v2  }
  0x25   : >> { %733 = vmatpush.msk.msra.mxu1 %vm211_vm0, %v681_v3  ;;  %v688_v5 = vld [vmem:[%s1193_s1 + $0x8] sm:$0x7]  ;;  %v714_v6 = vld [vmem:[%s1193_s1 + $0x18] sm:$0x7]  ;;  %682 = vmatpush.msk.msra.mxu0 %vm211_vm0, %v681_v3  ;;  %v695_v7 = vld [vmem:[%s1193_s1 + $0xc] sm:$0x7] }
  0x26   : >> { %689 = vmatpush.msk.msra.mxu2 %vm211_vm0, %v688_v5  ;;  %v701_v8 = vld [vmem:[%s1193_s1 + $0x10] sm:$0x7]  ;;  %v720_v9 = vld [vmem:[%s1193_s1 + $0x1c] sm:$0x7]  ;;  %s195_s4 = smul.u32 24, %s1072_s20  ;;  %696 = vmatpush.msk.msra.mxu3 %vm211_vm0, %v695_v7  ;;  %p557_p0 = scmp.lt.s32.totalorder %s1072_s20, 16 }
  0x27   : >> { %685 = vmatpush.msk.msrb.mxu1 %vm211_vm0, %v199_v4  ;;  %702 = vmatpush.msk.msrb.mxu0 %vm211_vm0, %v701_v8  ;;  %v707_v10 = vld [vmem:[%s1193_s1 + $0x14] sm:$0x7]  ;;  %v726_v11 = vld [vmem:[%s1193_s1 + $0x20] sm:$0x7]  ;;  %s192_s10 = sadd.s32 1, %s934_s10  }
  0x28   : >> { %715 = vmatpush.msk.msrb.mxu2 %vm211_vm0, %v714_v6  ;;  %721 = vmatpush.msk.msrb.mxu3 %vm211_vm0, %v720_v9  ;;  %s1088_s5 = scalar_lea.vmem %s1032_s7, %s195_s4  ;;  %v823_v60 = vld [vmem:[%s1194_s2] ss:$0 sm:$0xff]  ;;  %p189_p1 = scmp.ge.s32.totalorder %s192_s10, 8  }
  0x29   : >> { %v201_v12 = vld [vmem:[%s1088_s5 + $0x9] sm:$0xff]  ;;  %v200_v14 = vld [vmem:[%s1088_s5 + $0x1] sm:$0xff]  ;;  %v693_v15 = vld [vmem:[%s1088_s5 + $0x18] sm:$0xff]  ;;  %s558_s4 = scalar_select %p557_p0, 1, 0 }
  0x2a   : >> { %v270_v13 = vld [vmem:[%s1088_s5 + $0x2] sm:$0xff]  ;;  %684 = vmatmul.msk.f32.vlgmr.msra.gmra.mxu1 %vm204_vm1, %v201_v12  ;;  %683 = vmatmul.msk.f32.vlgmr.msra.gmra.mxu0 %vm204_vm1, %v200_v14  ;;  %v271_v17 = vld [vmem:[%s1088_s5 + $0xa] sm:$0xff]  ;;  %v699_v19 = vld [vmem:[%s1088_s5 + $0x19] sm:$0xff]  ;;  %p730_p2 = scmp.ne.s32.totalorder (%p189_p1), %s910_s15, 1 }
  0x2b   : >> { %690 = vmatmul.msk.f32.vlgmr.msra.gmra.mxu2 %vm204_vm1, %v270_v13  ;;  %697 = vmatmul.msk.f32.vlgmr.msra.gmra.mxu3 %vm204_vm1, %v693_v15  ;;  %v197_v16 = vld [vmem:[%s1088_s5] sm:$0xff]  ;;  %v198_v20 = vld [vmem:[%s1088_s5 + $0x8] sm:$0xff]  ;;  %v712_v21 = vld [vmem:[%s1088_s5 + $0x30] sm:$0xff]  ;;  %v559_v12 = vstv %s558_s4 }
  0x2c   : >> { %708 = vmatpush.msk.msra.mxu1 %vm211_vm0, %v707_v10  ;;  %727 = vmatpush.msk.msra.mxu0 %vm211_vm0, %v726_v11  ;;  %v694_v18 = vld [vmem:[%s1088_s5 + $0x20] sm:$0xff]  ;;  %v718_v23 = vld [vmem:[%s1088_s5 + $0x31] sm:$0xff]  ;;  %vm560_vm2 = vcmp.eq.s32.totalorder %v559_v12, 1 }
  0x2d   : >> { %v700_v22 = vld [vmem:[%s1088_s5 + $0x21] sm:$0xff]  ;;  %v713_v25 = vld [vmem:[%s1088_s5 + $0x38] sm:$0xff] }
  0x2e   : >> { %v705_v24 = vld [vmem:[%s1088_s5 + $0x1a] sm:$0xff]  ;;  %v724_v27 = vld [vmem:[%s1088_s5 + $0x32] sm:$0xff]  ;;  %v706_v28 = vld [vmem:[%s1088_s5 + $0x22] sm:$0xff] }
  0x2f   : >> { %v719_v26 = vld [vmem:[%s1088_s5 + $0x39] sm:$0xff] }
  0x30   : >> { %v725_v29 = vld [vmem:[%s1088_s5 + $0x3a] sm:$0xff] }
  0x32   : >> { %686 = vmatmul.msk.f32.vlgmr.msrb.gmra.mxu1 %vm204_vm1, %v197_v16  ;;  %703 = vmatmul.msk.f32.vlgmr.msrb.gmra.mxu0 %vm204_vm1, %v699_v19 }
  0x33   : >> { %691 = vmatmul.msk.f32.gmra.mxu2 %vm204_vm1, %v271_v17  ;;  %698 = vmatmul.msk.f32.gmra.mxu3 %vm204_vm1, %v694_v18 }
  0x3a   : >> { %687 = vmatmul.msk.f32.gmra.mxu1 %vm204_vm1, %v198_v20  ;;  %704 = vmatmul.msk.f32.gmra.mxu0 %vm204_vm1, %v700_v22 }
  0x3b   : >> { %716 = vmatmul.msk.f32.vlgmr.msrb.gmra.mxu2 %vm204_vm1, %v712_v21  ;;  %722 = vmatmul.msk.f32.vlgmr.msrb.gmra.mxu3 %vm204_vm1, %v718_v23 }
  0x42   : >> { %709 = vmatmul.msk.f32.vlgmr.msra.gmra.mxu1 %vm204_vm1, %v705_v24  ;;  %728 = vmatmul.msk.f32.vlgmr.msra.gmra.mxu0 %vm204_vm1, %v724_v27 }
  0x43   : >> { %717 = vmatmul.msk.f32.gmra.mxu2 %vm204_vm1, %v713_v25  ;;  %723 = vmatmul.msk.f32.gmra.mxu3 %vm204_vm1, %v719_v26 }
  0x4a   : >> { %710 = vmatmul.msk.f32.gmra.mxu1 %vm204_vm1, %v706_v28  ;;  %729 = vmatmul.msk.f32.gmra.mxu0 %vm204_vm1, %v725_v29 }
  0xa7   : >> { %v235_v30 = vpop.f32.mrf.mxu1  ;;  %v232_v31 = vpop.f32.mrf.mxu0 }
  0xae   : >> { %v300_v32 = vpop.f32.mrf.mxu2  ;;  %v341_v33 = vpop.f32.mrf.mxu3 }
  0xaf   : >> { %v264_v34 = vpop.f32.mrf.mxu1  ;;  %v379_v35 = vpop.f32.mrf.mxu0 }
  0xb0   : >> { %v265_v36 = vadd.f32 %v264_v34, %v232_v31 }
  0xb2   : >> { %v306_v38 = vadd.f32 %v300_v32, %v265_v36 }
  0xb4   : >> { %v347_v42 = vadd.f32 %v341_v33, %v306_v38 }
  0xb6   : >> { %v303_v37 = vpop.f32.mrf.mxu2  ;;  %v344_v39 = vpop.f32.mrf.mxu3  ;;  %v385_v45 = vadd.f32 %v379_v35, %v347_v42 }
  0xb7   : >> { %v267_v40 = vpop.f32.mrf.mxu1  ;;  %v382_v41 = vpop.f32.mrf.mxu0 }
  0xb8   : >> { %v268_v43 = vadd.f32 %v267_v40, %v235_v30 }
  0xba   : >> { %v307_v46 = vadd.f32 %v303_v37, %v268_v43 }
  0xbc   : >> { %v348_v51 = vadd.f32 %v344_v39, %v307_v46 }
  0xbe   : >> { %v458_v44 = vpop.f32.mrf.mxu2  ;;  %v496_v48 = vpop.f32.mrf.mxu3  ;;  %v386_v53 = vadd.f32 %v382_v41, %v348_v51 }
  0xbf   : >> { %v417_v47 = vpop.f32.mrf.mxu1  ;;  %v534_v50 = vpop.f32.mrf.mxu0 }
  0xc0   : >> { %v423_v49 = vadd.f32 %v417_v47, %v385_v45 }
  0xc2   : >> { %v464_v52 = vadd.f32 %v458_v44, %v423_v49 }
  0xc4   : >> { %v502_v54 = vadd.f32 %v496_v48, %v464_v52 }
  0xc6   : >> { %v461_v56 = vpop.f32.mrf.mxu2  ;;  %v499_v58 = vpop.f32.mrf.mxu3  ;;  %v540_v59 = vadd.f32 %v534_v50, %v502_v54 }
  0xc7   : >> { %v420_v55 = vpop.f32.mrf.mxu1  ;;  %v537_v62 = vpop.f32.mrf.mxu0 }
  0xc8   : >> { %v424_v57 = vadd.f32 %v420_v55, %v386_v53  ;;  %v546_v0 = vadd.f32 %v823_v60, %v540_v59 }
  0xca   : >> { %v465_v61 = vadd.f32 %v461_v56, %v424_v57  ;;  %v548_v5 = vmax.f32 %v546_v0, 0.0 }
  0xcc   : >> { %v503_v63 = vadd.f32 %v499_v58, %v465_v61 }
  0xce   : >> { %v541_v3 = vadd.f32 %v537_v62, %v503_v63 }
  0xd0   : >> { %v547_v4 = vadd.f32 %v823_v60, %v541_v3 }
  0xd2   : >> { %v549_v6 = vmax.f32 %v547_v4, 0.0 }
  0xd4   : >> { %v550_v7 = vadd.f32 %v549_v6, %v548_v5 }
  0xd6   : >> { %v551_v8 = vrot.slane %v550_v7, 4 }
  0xd8   : >> { %v552_v9 = vadd.f32 %v551_v8, %v550_v7 }
  0xda   : >> { %v553_v10 = vrot.slane %v552_v9, 2 }
  0xdc   : >> { %v554_v11 = vadd.f32 %v553_v10, %v552_v9 }
  0xde   : >> { %v555_v13 = vrot.slane %v554_v11, 1 }
  0xe0   : >> { %v556_v14 = vadd.f32 %v555_v13, %v554_v11 }
  0xe1   : > { %191 = sbr.rel (!%p189_p1) target bundleno = 36 (0x24), region = 93 }
  0xe2   : >> { %v561_v15 = vsel %vm560_vm2, %v556_v14, 0.0 }
  0xe3   : >> { %v562_v16 = vadd.f32 %v930_v2, %v561_v15  }
  0xe5   : >> { %v1198_v2 = vmov %v562_v16  ;;  %v563_v17 = vadd.f32 (%p189_p1), %v562_v16, %v1040_v1 }
  0xe6   : > { %568 = sbr.rel (%p730_p2) target bundleno = 242 (0xf2), region = 47 }
  0xe7   : > { %564 = vst [vmem:[#allocation2] sm:$0x1] %v563_v17 }
  0xee   : > { %v569_v18 = vld [vmem:[#allocation2] sm:$0x1] }
  0xef   : > { %v570_v19 = vmul.f32 0.00390625, %v569_v18 }
  0xf1   : > { %571 = vst [vmem:[%s1036_s8] sm:$0x1] %v570_v19 }
  0xf2 PF: > { %s581_s10 = scalar_lea.hbm %s1195_s3, %s914_s16  ;;  %s583_s6 = sshll.u32 %s1036_s8, 4  ;;  %s584_s6 = int_to_ptr.vmem [resolvable:$true] %s583_s6 }
  0xf3   : > { %s585_s7 = sshll.u32 %s581_s10, 4  ;;  %s573_s15 = scalar_lea.sflag [#allocation4], %s173_s29  ;;  %s586_s7 = int_to_ptr.hbm [resolvable:$true] %s585_s7 }
  0xf4   : > { %s838_s9 = sshra.s32 %s586_s7, 4  ;;  %s844_s27 = scalar_lea.hbm %s1195_s3, 2  ;;  %s839_s9 = int_to_ptr.hbm [resolvable:$true] %s838_s9 }
  0xf5   : > { %s840_s11 = scalar_lea.hbm %s839_s9, 1  ;;  %p845_p7 = scmp.lt.s32.totalorder %s839_s9, %s1195_s3 }
  0xf6   : > { %p841_p4 = scmp.ne.s32.totalorder %s839_s9, %s840_s11  ;;  %p846_p8 = scmp.lt.s32.totalorder %s844_s27, %s840_s11 }
  0xf8   : > { %p842_p5 = pnand %p841_p4, %p1006_p3  ;;  %p847_p10 = por %p846_p8, %p845_p7 }
  0xfa   : > { %p843_p6 = pneg %p842_p5 }
  0xfc   : > { %p848_p11 = pnand %p847_p10, %p843_p6 }
  0xfe   : > { %851 = shalt.err (!%p848_p11)
}
  0xff   : > { %735 = dma.vmem_to_hbm [thread:$0]  (%p1006_p3), %s584_s6, 16, %s586_s7, %s573_s15  }
 0x100 PF: > { %p741_p12 = scmp.ge.s32.totalorder %s926_s19, 2  ;;  %s597_s16 = sand.u32 1, %s898_s12  }
 0x101   : > { %s598_s29 = scalar_lea.sflag [#allocation4], %s597_s16 }
 0x102   : > { %p738_p13 = pnand %p741_p12, %p1016_p9 }
 0x104   : > { %p739_p0 = pneg %p738_p13 }
 0x106   : > { %893 = dma.done.wait (%p739_p0), %s598_s29, 16  }
 0x107   : > { %895 = vsyncadd (%p739_p0), %s598_s29, 4294967280  ;;  %s16_s19 = sadd.s32 1, %s926_s19   ;;  %s1199_s12 = smov %s902_s13 }
 0x108   : > { %p13_p1 = scmp.ge.s32.totalorder %s16_s19, 6   ;;  %s1200_s13 = smov %s906_s14 }
 0x109   : > { %s1201_s14 = smov %s1024_s28  ;;  %s1202_s15 = smov %s918_s17 }
 0x10a   : > { %s1203_s16 = smov %s922_s18  ;;  %s1204_s17 = smov %s1207_s22 }
 0x10b   : > { %s1205_s18 = smov %s1211_s23  ;;  %15 = sbr.rel (!%p13_p1) target bundleno = 5 (0x5), region = 104 }
 0x110   :  { %603 = vsyncpa [#allocation4], 1 }
 0x111   :  { %605 = vsyncpa [#allocation4 + $0x1], 1 }

</bundles_post_ra>
